<compile_context>
chip_gen: v6e
topology: v6e:2x2x1
jax: 0.10.0
libtpu: 0.0.40
codegen_flags: <defaults>
</compile_context>

<pallas_src>
import jax
import jax.numpy as jnp
from jax.experimental import pallas as pl
from jax.experimental.pallas import tpu as pltpu


def _linear_kernel(zt_ref, w_ref, b_ref, o_ref):
    # zt_ref: (q, tile) VMEM   w_ref: (q,) SMEM   b_ref: (1,) SMEM
    # o_ref:  (1, tile) VMEM   (lane-dense output slab)
    q = zt_ref.shape[0]
    # Pure VPU multiply-accumulate over full 128-lane vregs; weights/bias are
    # SMEM scalar reads.  Static unroll over q (tiny, q=5).
    acc = zt_ref[pl.ds(0, 1), :] * w_ref[0] + b_ref[0]
    for k in range(1, q):
        acc = acc + zt_ref[pl.ds(k, 1), :] * w_ref[k]
    o_ref[...] = acc.astype(o_ref.dtype)


def _round_up(x, m):
    return (x + m - 1) // m * m


def reduced_net_forward(Z, weight, bias, *, block_cols=65536,
                        min_pallas_rows=1024, force_pallas=False):
    """Equivalent of Reduced_Net.forward: nn.Linear(q, 1)(Z).

    Z:      (N, q) float32
    weight: (1, q) float32   (PyTorch nn.Linear weight layout)
    bias:   (1,)   float32
    returns (N, 1) float32
    """
    N, q = Z.shape

    # Tiny head: let XLA fuse it into the surrounding graph instead of paying
    # custom-call launch + HBM round-trip overhead.
    if not force_pallas and N < min_pallas_rows:
        return Z @ weight.T + bias[None, :]

    # Lane-dense formulation: N on the 128-lane axis.
    Zt = Z.T                    # (q, N)
    w = weight.reshape(q)       # (q,)  -> SMEM scalars
    b = bias.reshape(1)         # (1,)  -> SMEM scalar

    if N <= 256:
        # Whole-array block (legal regardless of 128-divisibility because the
        # block dims equal the full array dims).
        tile = N
        grid = (1,)
    else:
        # Lane tile: multiple of 128, capped at block_cols (~8 MiB of
        # double-buffered VMEM incl. sublane padding -> safe on v7x's 64 MiB
        # VMEM as well as v5e/v6e), and chosen so the grid has >= 2 steps so
        # the "parallel" axis can shard across v7x's two TensorCores.  Pallas
        # masks the ragged last lane block (OOB output lanes are not written).
        tile = min(block_cols, _round_up(pl.cdiv(N, 2), 128))
        grid = (pl.cdiv(N, tile),)

    y = pl.pallas_call(
        _linear_kernel,
        out_shape=jax.ShapeDtypeStruct((1, N), Z.dtype),
        grid=grid,
        in_specs=[
            pl.BlockSpec((q, tile), lambda i: (0, i)),          # Z^T lane tile
            pl.BlockSpec(memory_space=pltpu.MemorySpace.SMEM),  # weights (q,)
            pl.BlockSpec(memory_space=pltpu.MemorySpace.SMEM),  # bias (1,)
        ],
        out_specs=pl.BlockSpec((1, tile), lambda i: (0, i)),    # lane-dense out
        compiler_params=pltpu.CompilerParams(
            dimension_semantics=("parallel",),
        ),
        cost_estimate=pl.CostEstimate(
            flops=2 * N * q,
            transcendentals=0,
            bytes_accessed=4 * (N * q + N + q + 1),
        ),
    )(Zt, w, b)

    return y.reshape(N, 1)


if __name__ == "__main__":
    q = 5
    N = 8  # small batch, consistent with the module's toy usage

    key = jax.random.PRNGKey(0)
    k_z, k_w, k_b, k_z2 = jax.random.split(key, 4)

    # Deterministic params (mimics nn.Linear uniform(-1/sqrt(q), 1/sqrt(q)))
    bound = 1.0 / (q ** 0.5)
    Z = jax.random.normal(k_z, (N, q), dtype=jnp.float32)
    weight = jax.random.uniform(k_w, (1, q), dtype=jnp.float32,
                                minval=-bound, maxval=bound)
    bias = jax.random.uniform(k_b, (1,), dtype=jnp.float32,
                              minval=-bound, maxval=bound)

    ref = Z @ weight.T + bias[None, :]

    # 1) Small case forced through the Pallas kernel (single whole-array block).
    out = reduced_net_forward(Z, weight, bias, force_pallas=True)
    out = jax.block_until_ready(out)
    assert out.shape == (N, 1)
    assert jnp.allclose(out, ref, atol=1e-5, rtol=1e-5), "mismatch (small N, pallas)"

    # 2) Same small case through the XLA-fused fast path (dispatch below threshold).
    out_fused = reduced_net_forward(Z, weight, bias)
    out_fused = jax.block_until_ready(out_fused)
    assert jnp.allclose(out_fused, ref, atol=1e-5, rtol=1e-5), "mismatch (small N, fused)"

    # 3) Larger case exercising the multi-step tiled grid (2 steps, ragged last
    #    lane block) through Pallas.
    N2 = 10000
    Z2 = jax.random.normal(k_z2, (N2, q), dtype=jnp.float32)
    out2 = reduced_net_forward(Z2, weight, bias)
    out2 = jax.block_until_ready(out2)
    ref2 = Z2 @ weight.T + bias[None, :]
    assert out2.shape == (N2, 1)
    assert jnp.allclose(out2, ref2, atol=1e-4, rtol=1e-5), "mismatch (tiled N)"

    print("KERNEL_OK")
</pallas_src>

<mosaic_0001>
module attributes {stable_mosaic.version = 11 : i64} {
  func.func @_linear_kernel(%arg0: i32, %arg1: memref<5x8xf32, #tpu.memory_space<vmem>>, %arg2: memref<5xf32, #tpu.memory_space<smem>>, %arg3: memref<1xf32, #tpu.memory_space<smem>>, %arg4: memref<1x8xf32, #tpu.memory_space<vmem>>) attributes {dimension_semantics = [#tpu.dimension_semantics<parallel>], iteration_bounds = array<i64: 1>, scalar_prefetch = 0 : i64, scratch_operands = 0 : i64, tpu.core_type = #tpu.core_type<tc>, window_params = [{transform_indices = @transform_0, window_bounds = array<i64: 5, 8>}, {transform_indices = @transform_1, window_bounds = array<i64: 5>}, {transform_indices = @transform_2, window_bounds = array<i64: 1>}, {transform_indices = @transform_3, window_bounds = array<i64: 1, 8>}]} {
    %c0 = arith.constant 0 : index
    %c0_0 = arith.constant 0 : index
    %0 = vector.load %arg1[%c0, %c0_0] : memref<5x8xf32, #tpu.memory_space<vmem>>, vector<1x8xf32>
    %c0_1 = arith.constant 0 : index
    %1 = memref.load %arg2[%c0_1] : memref<5xf32, #tpu.memory_space<smem>>
    %2 = vector.broadcast %1 : f32 to vector<1x8xf32>
    %3 = arith.mulf %0, %2 : vector<1x8xf32>
    %c0_2 = arith.constant 0 : index
    %4 = memref.load %arg3[%c0_2] : memref<1xf32, #tpu.memory_space<smem>>
    %5 = vector.broadcast %4 : f32 to vector<1x8xf32>
    %6 = arith.addf %3, %5 : vector<1x8xf32>
    %c1 = arith.constant 1 : index
    %c0_3 = arith.constant 0 : index
    %7 = vector.load %arg1[%c1, %c0_3] : memref<5x8xf32, #tpu.memory_space<vmem>>, vector<1x8xf32>
    %c1_4 = arith.constant 1 : index
    %8 = memref.load %arg2[%c1_4] : memref<5xf32, #tpu.memory_space<smem>>
    %9 = vector.broadcast %8 : f32 to vector<1x8xf32>
    %10 = arith.mulf %7, %9 : vector<1x8xf32>
    %11 = arith.addf %6, %10 : vector<1x8xf32>
    %c2 = arith.constant 2 : index
    %c0_5 = arith.constant 0 : index
    %12 = vector.load %arg1[%c2, %c0_5] : memref<5x8xf32, #tpu.memory_space<vmem>>, vector<1x8xf32>
    %c2_6 = arith.constant 2 : index
    %13 = memref.load %arg2[%c2_6] : memref<5xf32, #tpu.memory_space<smem>>
    %14 = vector.broadcast %13 : f32 to vector<1x8xf32>
    %15 = arith.mulf %12, %14 : vector<1x8xf32>
    %16 = arith.addf %11, %15 : vector<1x8xf32>
    %c3 = arith.constant 3 : index
    %c0_7 = arith.constant 0 : index
    %17 = vector.load %arg1[%c3, %c0_7] : memref<5x8xf32, #tpu.memory_space<vmem>>, vector<1x8xf32>
    %c3_8 = arith.constant 3 : index
    %18 = memref.load %arg2[%c3_8] : memref<5xf32, #tpu.memory_space<smem>>
    %19 = vector.broadcast %18 : f32 to vector<1x8xf32>
    %20 = arith.mulf %17, %19 : vector<1x8xf32>
    %21 = arith.addf %16, %20 : vector<1x8xf32>
    %c4 = arith.constant 4 : index
    %c0_9 = arith.constant 0 : index
    %22 = vector.load %arg1[%c4, %c0_9] : memref<5x8xf32, #tpu.memory_space<vmem>>, vector<1x8xf32>
    %c4_10 = arith.constant 4 : index
    %23 = memref.load %arg2[%c4_10] : memref<5xf32, #tpu.memory_space<smem>>
    %24 = vector.broadcast %23 : f32 to vector<1x8xf32>
    %25 = arith.mulf %22, %24 : vector<1x8xf32>
    %26 = arith.addf %21, %25 : vector<1x8xf32>
    %c0_11 = arith.constant 0 : index
    %c0_12 = arith.constant 0 : index
    %27 = vector.load %arg4[%c0_11, %c0_12] : memref<1x8xf32, #tpu.memory_space<vmem>>, vector<1x8xf32>
    tpu.vector_store %arg4[%c0_11, %c0_12], %26 {strides = array<i32>} : memref<1x8xf32, #tpu.memory_space<vmem>>, vector<1x8xf32>,
    return
  }
  func.func @transform_0(%arg0: i32) -> (i32, i32) {
    %c0_i32 = arith.constant 0 : i32
    %c0_i32_0 = arith.constant 0 : i32
    return %c0_i32, %arg0 : i32, i32
  }
  func.func @transform_1(%arg0: i32) -> i32 {
    %c0_i32 = arith.constant 0 : i32
    %c0_i32_0 = arith.constant 0 : i32
    return %c0_i32 : i32
  }
  func.func @transform_2(%arg0: i32) -> i32 {
    %c0_i32 = arith.constant 0 : i32
    %c0_i32_0 = arith.constant 0 : i32
    return %c0_i32 : i32
  }
  func.func @transform_3(%arg0: i32) -> (i32, i32) {
    %c0_i32 = arith.constant 0 : i32
    %c0_i32_0 = arith.constant 0 : i32
    return %c0_i32, %arg0 : i32, i32
  }
}

</mosaic_0001>

<bundles_post_ra>
// kernel: tpu_custom_call.1
= control target key start
LH: loop header
LB: loop body
LE: loop exit
PB: predicated region body
PF: predicated region fallthrough
CT: control target
= control target key end

     0   :  { %9 = vsyncpa [#allocation4], 0  ;;  %s186_s0 = inlined_call_operand.hbm [shape: f32[5,8], index: 0, kind: input, shape index: {}]   ;;  %s187_s1 = inlined_call_operand.vmem [shape: f32[5], index: 1, kind: input, shape index: {}]   ;;  %s188_s2 = inlined_call_operand.<no memory space> [shape: f32[1], index: 2, kind: input, shape index: {}]   ;;  %s189_s3 = inlined_call_operand.hbm [shape: f32[1,8], index: 3, kind: output, shape index: {}]  }
   0x1   :  { %10 = vsyncpa [#allocation6], 0 }
   0x2   :  { %11 = vsyncpa [#allocation5], 0  ;;  %s28_s14 = sshll.u32 %s187_s1, 4  ;;  %s151_s15 = smov [#allocation3]   ;;  %s29_s14 = int_to_ptr.vmem [resolvable:$true] %s28_s14 }
   0x3   :  { %s18_s16 = sshll.u32 %s151_s15, 4  ;;  %s19_s16 = int_to_ptr.vmem [resolvable:$true] %s18_s16 }
   0x4   :  { %s101_s17 = scalar_lea.vmem %s19_s16, 128  ;;  %p106_p1 = scmp.lt.s32.totalorder %s19_s16, %s19_s16 }
   0x5   :  { %p102_p0 = scmp.ne.s32.totalorder %s19_s16, %s101_s17  ;;  %p107_p2 = scmp.lt.s32.totalorder %s101_s17, %s101_s17 }
   0x7   :  { %p108_p3 = por %p107_p2, %p106_p1 }
   0x9   :  { %p109_p4 = pnand %p108_p3, %p102_p0 }
   0xb   :  { %112 = shalt.err (!%p109_p4)
}
   0xc   :  { %21 = dma.hbm_to_vmem [thread:$0]  %s186_s0, 128, %s19_s16, [#allocation4]  }
   0xd   :  { %s113_s20 = scalar_lea.vmem %s29_s14, 16  ;;  %p118_p6 = scmp.lt.s32.totalorder %s29_s14, %s29_s14 }
   0xe   :  { %p114_p5 = scmp.ne.s32.totalorder %s29_s14, %s113_s20  ;;  %p119_p7 = scmp.lt.s32.totalorder %s113_s20, %s113_s20 }
  0x10   :  { %p120_p8 = por %p119_p7, %p118_p6 }
  0x12   :  { %p121_p9 = pnand %p120_p8, %p114_p5 }
  0x14   :  { %124 = shalt.err (!%p121_p9)
}
  0x15   :  { %s152_s1 = smov [#allocation7]  }
  0x16   :  { %31 = dma.vmem_to_smem %s29_s14, 16, %s152_s1, [#allocation6]  }
  0x17   :  { %145 = dma.done.wait [#allocation4], 128  }
  0x18   :  { %146 = vsyncadd [#allocation4], 4294967168 }
  0x19   :  { %147 = dma.done.wait [#allocation6], 16  }
  0x1a   :  { %148 = vsyncadd [#allocation6], 4294967280 }
  0x1b   :  { %40 = sfence }
  0x1c   :  { %s42_s21 = sld [smem:[#allocation7]]  ;;  %v41_v0 = vld [vmem:[#allocation3] sm:$0x1]  ;;  %v48_v1 = vld [vmem:[#allocation3 + $0x1] sm:$0x1]  ;;  %v46_v3 = vstv %s188_s2  ;;  %s153_s27 = smov [#allocation8]  }
  0x1d   :  { %s86_s22 = sld [smem:[#allocation7 + $0x1]]  ;;  %v53_v4 = vld [vmem:[#allocation3 + $0x2] sm:$0x1]  ;;  %v58_v9 = vld [vmem:[#allocation3 + $0x3] sm:$0x1]  ;;  %s76_s28 = sshll.u32 %s153_s27, 4  ;;  %s77_s28 = int_to_ptr.vmem [resolvable:$true] %s76_s28 }
  0x1e   :  { %s87_s23 = sld [smem:[#allocation7 + $0x2]]  ;;  %v63_v13 = vld [vmem:[#allocation3 + $0x4] sm:$0x1]  ;;  %vm68_vm0 = vcmask 57344   ;;  %s125_s2 = scalar_lea.vmem %s77_s28, 16 }
  0x1f   :  { %s88_s24 = sld [smem:[#allocation7 + $0x3]]  ;;  %p126_p10 = scmp.ne.s32.totalorder %s77_s28, %s125_s2 }
  0x20   :  { %s89_s0 = sld [smem:[#allocation7 + $0x4]]  ;;  %s129_s29 = scalar_lea.vmem %s77_s28, 32 }
  0x21   :  { %p130_p11 = scmp.lt.s32.totalorder %s77_s28, %s77_s28  ;;  %p131_p12 = scmp.lt.s32.totalorder %s129_s29, %s125_s2 }
  0x22   :  { %v43_v2 = vstv %s42_s21 }
  0x23   :  { %v44_v5 = vmul.f32 %v43_v2, %v41_v0  ;;  %v50_v6 = vstv %s86_s22  ;;  %p132_p13 = por %p131_p12, %p130_p11 }
  0x24   :  { %v51_v7 = vmul.f32 %v50_v6, %v48_v1  ;;  %v55_v8 = vstv %s87_s23 }
  0x25   :  { %v47_v10 = vadd.f32 %v46_v3, %v44_v5  ;;  %v56_v11 = vmul.f32 %v55_v8, %v53_v4  ;;  %v60_v12 = vstv %s88_s24  ;;  %p133_p0 = pnand %p132_p13, %p126_p10 }
  0x26   :  { %v65_v14 = vstv %s89_s0  ;;  %v61_v16 = vmul.f32 %v60_v12, %v58_v9 }
  0x27   :  { %v52_v15 = vadd.f32 %v51_v7, %v47_v10  ;;  %v66_v18 = vmul.f32 %v65_v14, %v63_v13 }
  0x29   :  { %v57_v17 = vadd.f32 %v56_v11, %v52_v15 }
  0x2b   :  { %v62_v19 = vadd.f32 %v61_v16, %v57_v17 }
  0x2d   :  { %v67_v20 = vadd.f32 %v66_v18, %v62_v19 }
  0x2f   :  { %69 = vst.msk [vmem:[#allocation8] sm:$0x1] %vm68_vm0, %v67_v20 }
  0x30   :  { %136 = shalt.err (!%p133_p0)
}
  0x31   :  { %79 = dma.vmem_to_hbm [thread:$0]  %s77_s28, 16, %s189_s3, [#allocation5]  }
  0x32   :  { %149 = dma.done.wait [#allocation5], 16  }
  0x33   :  { %150 = vsyncadd [#allocation5], 4294967280 }
  0x34   :  { %83 = vsyncpa [#allocation4], 1 }
  0x35   :  { %84 = vsyncpa [#allocation5], 1 }
  0x36   :  { %85 = vsyncpa [#allocation6], 1 }

</bundles_post_ra>
